<compile_context>
chip_gen: v7x
topology: tpu7x:2x2x1
jax: 0.10.0
libtpu: 0.0.40
codegen_flags: <defaults>
</compile_context>

<pallas_src>
import jax
import jax.numpy as jnp
from jax.experimental import pallas as pl
from jax.experimental.pallas import tpu as pltpu

HIDDEN = 512


def _round_up(x, m):
    return ((x + m - 1) // m) * m


def _vmem_estimate(tm, tn, v):
    """Rough per-step VMEM footprint in bytes."""
    return (
        v * HIDDEN * 2            # W1 (bf16), single-buffered / resident
        + HIDDEN * 4              # b1 (f32)
        + 2 * HIDDEN * tn * 2     # W2 column block (bf16), double-buffered
        + 2 * tn * 4              # b2 column block (f32), double-buffered
        + 2 * tm * v * 4          # x row tile (f32), double-buffered
        + 2 * tm * tn * 4         # out tile (f32), double-buffered
        + tm * HIDDEN * 4         # h scratch (f32)
    )


def _ff_kernel(x_ref, w1_ref, b1_ref, w2_ref, b2_ref, o_ref, h_ref):
    # Hidden activation is computed once per row tile (j == 0) and reused
    # across all vocab-column tiles j.
    @pl.when(pl.program_id(1) == 0)
    def _():
        h = jnp.dot(x_ref[...].astype(jnp.bfloat16), w1_ref[...],
                    preferred_element_type=jnp.float32)
        # bias + ReLU in f32 on the VPU (free under the MXU, v5e-friendly).
        h_ref[...] = jnp.maximum(h + b1_ref[...], 0.0)

    y = jnp.dot(h_ref[...].astype(jnp.bfloat16), w2_ref[...],
                preferred_element_type=jnp.float32)
    # Dropout(0.2) in eval mode == identity.
    o_ref[...] = (y + b2_ref[...]).astype(o_ref.dtype)


def feed_forward(x, w1, b1, w2, b2, *, tm=256, tn=512):
    """y = relu(x @ W1 + b1) @ W2 + b2 (dropout = identity, eval mode).

    x: (M, V) f32.  Torch Linear weights (out, in) are stored pre-transposed:
    w1: (V, 512), b1: (512,), w2: (512, V), b2: (V,).
    """
    assert x.ndim == 2
    M, V = x.shape
    out_dtype = x.dtype

    # ---- tile sizes: large row tile for MXU occupancy, lane-dense col tile ----
    tm = int(min(tm, _round_up(M, 8)))
    tn = int(min(tn, _round_up(V, 128)))
    budget = 48 * 1024 * 1024          # v7x-safe VMEM budget
    while _vmem_estimate(tm, tn, V) > budget and tm > 8:
        tm = max(8, tm // 2)
    while _vmem_estimate(tm, tn, V) > budget and tn > 128:
        tn = max(128, tn // 2)
    tm = _round_up(tm, 8)
    tn = _round_up(tn, 128)

    m_pad = _round_up(M, tm)
    n_pad = _round_up(V, tn)

    # ---- pad ragged dims with zeros (sliced off after the call) ----
    x_p = x if m_pad == M else jnp.pad(x, ((0, m_pad - M), (0, 0)))
    w2_p = w2 if n_pad == V else jnp.pad(w2, ((0, 0), (0, n_pad - V)))
    b2_p = b2 if n_pad == V else jnp.pad(b2, ((0, n_pad - V),))

    # bf16 weights: MXU-native, halves weight DMA bytes and VMEM residency.
    w1_bf = w1.astype(jnp.bfloat16)
    w2_bf = w2_p.astype(jnp.bfloat16)
    b1_2d = b1.reshape(1, HIDDEN).astype(jnp.float32)
    b2_2d = b2_p.reshape(1, n_pad).astype(jnp.float32)

    grid = (m_pad // tm, n_pad // tn)

    vmem_est = _vmem_estimate(tm, tn, V)
    vmem_limit = int(min(max(2 * vmem_est, 32 * 1024 * 1024),
                         64 * 1024 * 1024))

    itemsize = jnp.dtype(out_dtype).itemsize
    cost = pl.CostEstimate(
        flops=4 * M * V * HIDDEN,                       # two matmuls
        transcendentals=0,
        bytes_accessed=int(M * V * itemsize            # x
                           + V * HIDDEN * 2            # W1 (bf16)
                           + HIDDEN * V * 2            # W2 (bf16)
                           + HIDDEN * 4 + V * 4        # biases
                           + M * V * itemsize),        # out
    )

    out_padded = pl.pallas_call(
        _ff_kernel,
        out_shape=jax.ShapeDtypeStruct((m_pad, n_pad), out_dtype),
        grid_spec=pltpu.PrefetchScalarGridSpec(
            num_scalar_prefetch=0,
            grid=grid,
            in_specs=[
                # x row tile (constant across j)
                pl.BlockSpec((tm, V), lambda i, j: (i, 0)),
                # W1 / b1: constant index -> single buffer (halves their VMEM)
                pl.BlockSpec((V, HIDDEN), lambda i, j: (0, 0),
                             pipeline_mode=pl.Buffered(1)),
                pl.BlockSpec((1, HIDDEN), lambda i, j: (0, 0),
                             pipeline_mode=pl.Buffered(1)),
                # W2 / b2: vocab-column tiles
                pl.BlockSpec((HIDDEN, tn), lambda i, j: (0, j)),
                pl.BlockSpec((1, tn), lambda i, j: (0, j)),
            ],
            out_specs=pl.BlockSpec((tm, tn), lambda i, j: (i, j)),
            scratch_shapes=[pltpu.VMEM((tm, HIDDEN), jnp.float32)],
        ),
        compiler_params=pltpu.CompilerParams(
            dimension_semantics=("parallel", "arbitrary"),
            vmem_limit_bytes=vmem_limit,
        ),
        cost_estimate=cost,
    )(x_p, w1_bf, b1_2d, w2_bf, b2_2d)

    return out_padded[:M, :V]


def _ref_forward_f32(x, w1, b1, w2, b2):
    h = jnp.maximum(x @ w1 + b1, 0.0)
    return h @ w2 + b2


def _ref_forward_bf16(x, w1, b1, w2, b2):
    """Reference mirroring the kernel's bf16-input / f32-accumulate matmuls."""
    bf = jnp.bfloat16
    h = jnp.dot(x.astype(bf), w1.astype(bf), preferred_element_type=jnp.float32)
    h = jnp.maximum(h + b1, 0.0)
    y = jnp.dot(h.astype(bf), w2.astype(bf), preferred_element_type=jnp.float32)
    return y + b2


def _make_params(vocab, key):
    # Mimic torch.nn.Linear init (uniform +/- 1/sqrt(fan_in)), pre-transposed
    # to (in, out).
    k1, k2, k3, k4 = jax.random.split(key, 4)
    lim1 = 1.0 / jnp.sqrt(vocab)
    lim2 = 1.0 / jnp.sqrt(HIDDEN)
    w1 = jax.random.uniform(k1, (vocab, HIDDEN), jnp.float32, -lim1, lim1)
    b1 = jax.random.uniform(k2, (HIDDEN,), jnp.float32, -lim1, lim1)
    w2 = jax.random.uniform(k3, (HIDDEN, vocab), jnp.float32, -lim2, lim2)
    b2 = jax.random.uniform(k4, (vocab,), jnp.float32, -lim2, lim2)
    return w1, b1, w2, b2


def _check(out, x, w1, b1, w2, b2):
    ref_bf = _ref_forward_bf16(x, w1, b1, w2, b2)
    ref_f32 = _ref_forward_f32(x, w1, b1, w2, b2)
    assert out.shape == x.shape
    assert jnp.allclose(out, ref_bf, atol=2e-2, rtol=2e-2), "mismatch vs bf16 ref"
    assert jnp.allclose(out, ref_f32, atol=1e-1, rtol=1e-1), "mismatch vs f32 ref"


if __name__ == "__main__":
    key = jax.random.PRNGKey(0)
    k_a, k_b, kx_a, kx_b = jax.random.split(key, 4)

    # Case 1: small aligned shapes, default (large) tiles -> single grid step.
    vocab_a, batch_a = 256, 16
    w1a, b1a, w2a, b2a = _make_params(vocab_a, k_a)
    xa = jax.random.normal(kx_a, (batch_a, vocab_a), jnp.float32)
    out_a = jax.block_until_ready(feed_forward(xa, w1a, b1a, w2a, b2a))
    _check(out_a, xa, w1a, b1a, w2a, b2a)

    # Case 2: ragged shapes + small tiles -> multi-tile grid, padding, and
    # h-scratch reuse across vocab-column tiles.
    vocab_b, batch_b = 320, 20
    w1b, b1b, w2b, b2b = _make_params(vocab_b, k_b)
    xb = jax.random.normal(kx_b, (batch_b, vocab_b), jnp.float32)
    out_b = jax.block_until_ready(
        feed_forward(xb, w1b, b1b, w2b, b2b, tm=16, tn=128))
    _check(out_b, xb, w1b, b1b, w2b, b2b)

    print("KERNEL_OK")
</pallas_src>

<mosaic_0001>
module attributes {stable_mosaic.version = 11 : i64} {
  func.func @_ff_kernel(%arg0: i32, %arg1: i32, %arg2: memref<16x256xf32, #tpu.memory_space<vmem>>, %arg3: memref<256x512xbf16, #tpu.memory_space<vmem>>, %arg4: memref<1x512xf32, #tpu.memory_space<vmem>>, %arg5: memref<512x256xbf16, #tpu.memory_space<vmem>>, %arg6: memref<1x256xf32, #tpu.memory_space<vmem>>, %arg7: memref<16x256xf32, #tpu.memory_space<vmem>>, %arg8: memref<16x512xf32, #tpu.memory_space<vmem>>) attributes {dimension_semantics = [#tpu.dimension_semantics<parallel>, #tpu.dimension_semantics<arbitrary>], iteration_bounds = array<i64: 1, 1>, scalar_prefetch = 0 : i64, scratch_operands = 1 : i64, tpu.core_type = #tpu.core_type<tc>, window_params = [{transform_indices = @transform_0, window_bounds = array<i64: 16, 256>}, {pipeline_mode = #tpu.pipeline_mode<synchronous>, transform_indices = @transform_1, window_bounds = array<i64: 256, 512>}, {pipeline_mode = #tpu.pipeline_mode<synchronous>, transform_indices = @transform_2, window_bounds = array<i64: 1, 512>}, {transform_indices = @transform_3, window_bounds = array<i64: 512, 256>}, {transform_indices = @transform_4, window_bounds = array<i64: 1, 256>}, {transform_indices = @transform_5, window_bounds = array<i64: 16, 256>}]} {
    %c0_i32 = arith.constant 0 : i32
    %0 = arith.cmpi eq, %arg1, %c0_i32 : i32
    %1 = arith.extui %0 : i1 to i32
    %c0_i32_0 = arith.constant 0 : i32
    %2 = arith.cmpi ne, %1, %c0_i32_0 : i32
    scf.if %2 {
      %c0_8 = arith.constant 0 : index
      %c0_9 = arith.constant 0 : index
      %11 = vector.load %arg2[%c0_8, %c0_9] : memref<16x256xf32, #tpu.memory_space<vmem>>, vector<16x256xf32>
      %12 = arith.truncf %11 : vector<16x256xf32> to vector<16x256xbf16>
      %c0_10 = arith.constant 0 : index
      %c0_11 = arith.constant 0 : index
      %13 = vector.load %arg3[%c0_10, %c0_11] : memref<256x512xbf16, #tpu.memory_space<vmem>>, vector<256x512xbf16>
      %cst_12 = arith.constant dense<0.000000e+00> : vector<16x512xf32>
      %14 = tpu.matmul %12, %13, %cst_12 {dimension_numbers = #tpu.dot_dimension_numbers<[1], [0], [0], [1], [0, 0, 1, 1], [], []>} : vector<16x256xbf16>, vector<256x512xbf16>, vector<16x512xf32> -> vector<16x512xf32>
      %c0_13 = arith.constant 0 : index
      %c0_14 = arith.constant 0 : index
      %15 = vector.load %arg4[%c0_13, %c0_14] : memref<1x512xf32, #tpu.memory_space<vmem>>, vector<1x512xf32>
      %16 = vector.broadcast %15 : vector<1x512xf32> to vector<16x512xf32>
      %17 = arith.addf %14, %16 : vector<16x512xf32>
      %cst_15 = arith.constant 0.000000e+00 : f32
      %18 = vector.broadcast %cst_15 : f32 to vector<16x512xf32>
      %19 = arith.maximumf %17, %18 : vector<16x512xf32>
      %c0_16 = arith.constant 0 : index
      %c0_17 = arith.constant 0 : index
      %20 = vector.load %arg8[%c0_16, %c0_17] : memref<16x512xf32, #tpu.memory_space<vmem>>, vector<16x512xf32>
      tpu.vector_store %arg8[%c0_16, %c0_17], %19 {strides = array<i32>} : memref<16x512xf32, #tpu.memory_space<vmem>>, vector<16x512xf32>,
    } else {
    }
    %c0 = arith.constant 0 : index
    %c0_1 = arith.constant 0 : index
    %3 = vector.load %arg8[%c0, %c0_1] : memref<16x512xf32, #tpu.memory_space<vmem>>, vector<16x512xf32>
    %4 = arith.truncf %3 : vector<16x512xf32> to vector<16x512xbf16>
    %c0_2 = arith.constant 0 : index
    %c0_3 = arith.constant 0 : index
    %5 = vector.load %arg5[%c0_2, %c0_3] : memref<512x256xbf16, #tpu.memory_space<vmem>>, vector<512x256xbf16>
    %cst = arith.constant dense<0.000000e+00> : vector<16x256xf32>
    %6 = tpu.matmul %4, %5, %cst {dimension_numbers = #tpu.dot_dimension_numbers<[1], [0], [0], [1], [0, 0, 1, 1], [], []>} : vector<16x512xbf16>, vector<512x256xbf16>, vector<16x256xf32> -> vector<16x256xf32>
    %c0_4 = arith.constant 0 : index
    %c0_5 = arith.constant 0 : index
    %7 = vector.load %arg6[%c0_4, %c0_5] : memref<1x256xf32, #tpu.memory_space<vmem>>, vector<1x256xf32>
    %8 = vector.broadcast %7 : vector<1x256xf32> to vector<16x256xf32>
    %9 = arith.addf %6, %8 : vector<16x256xf32>
    %c0_6 = arith.constant 0 : index
    %c0_7 = arith.constant 0 : index
    %10 = vector.load %arg7[%c0_6, %c0_7] : memref<16x256xf32, #tpu.memory_space<vmem>>, vector<16x256xf32>
    tpu.vector_store %arg7[%c0_6, %c0_7], %9 {strides = array<i32>} : memref<16x256xf32, #tpu.memory_space<vmem>>, vector<16x256xf32>,
    return
  }
  func.func @transform_0(%arg0: i32, %arg1: i32) -> (i32, i32) {
    %c0_i32 = arith.constant 0 : i32
    %c0_i32_0 = arith.constant 0 : i32
    return %arg0, %c0_i32 : i32, i32
  }
  func.func @transform_1(%arg0: i32, %arg1: i32) -> (i32, i32) {
    %c0_i32 = arith.constant 0 : i32
    %c0_i32_0 = arith.constant 0 : i32
    %c0_i32_1 = arith.constant 0 : i32
    return %c0_i32, %c0_i32_0 : i32, i32
  }
  func.func @transform_2(%arg0: i32, %arg1: i32) -> (i32, i32) {
    %c0_i32 = arith.constant 0 : i32
    %c0_i32_0 = arith.constant 0 : i32
    %c0_i32_1 = arith.constant 0 : i32
    return %c0_i32, %c0_i32_0 : i32, i32
  }
  func.func @transform_3(%arg0: i32, %arg1: i32) -> (i32, i32) {
    %c0_i32 = arith.constant 0 : i32
    %c0_i32_0 = arith.constant 0 : i32
    return %c0_i32, %arg1 : i32, i32
  }
  func.func @transform_4(%arg0: i32, %arg1: i32) -> (i32, i32) {
    %c0_i32 = arith.constant 0 : i32
    %c0_i32_0 = arith.constant 0 : i32
    return %c0_i32, %arg1 : i32, i32
  }
  func.func @transform_5(%arg0: i32, %arg1: i32) -> (i32, i32) {
    %c0_i32 = arith.constant 0 : i32
    return %arg0, %arg1 : i32, i32
  }
}

</mosaic_0001>

<bundles_post_ra>
// kernel: tpu_custom_call.1
= control target key start
LH: loop header
LB: loop body
LE: loop exit
PB: predicated region body
PF: predicated region fallthrough
CT: control target
= control target key end

     0   :  { %10 = vsyncpa [#allocation4], 0  ;;  %s1662_s0 = inlined_call_operand.hbm [shape: f32[16,256], index: 0, kind: input, shape index: {}]   ;;  %s1663_s1 = inlined_call_operand.hbm [shape: bf16[256,512], index: 1, kind: input, shape index: {}]   ;;  %s1664_s2 = inlined_call_operand.vmem [shape: f32[1,512], index: 2, kind: input, shape index: {}]   ;;  %s1665_s3 = inlined_call_operand.hbm [shape: bf16[512,256], index: 3, kind: input, shape index: {}]   ;;  %s1666_s4 = inlined_call_operand.vmem [shape: f32[1,256], index: 4, kind: input, shape index: {}]   ;;  %s1667_s5 = inlined_call_operand.hbm [shape: f32[16,256], index: 5, kind: output, shape index: {}]  }
   0x1   :  { %11 = vsyncpa [#allocation7], 0 }
   0x2   :  { %12 = vsyncpa [#allocation5], 0  ;;  %s1526_s18 = smov [#allocation6]   ;;  %s1527_s20 = smov [#allocation3]  }
   0x3   :  { %s30_s19 = sshll.u32 %s1526_s18, 4  ;;  %s18_s21 = sshll.u32 %s1527_s20, 4  ;;  %s31_s19 = int_to_ptr.vmem [resolvable:$true] %s30_s19  ;;  %s1564_s21 = int_to_ptr.vmem [resolvable:$true] %s18_s21 }
   0x4   :  { %s1432_s24 = scalar_lea.hbm %s1663_s1, 8192 }
   0x5   :  { %p1433_p0 = scmp.ne.s32.totalorder %s1663_s1, %s1432_s24  ;;  %p1436_p1 = scmp.lt.u32.totalorder %s1432_s24, %s1663_s1 }
   0x7   :  { %p1438_p2 = pnand %p1436_p1, %p1433_p0 }
   0x9   :  { %1441 = shalt.err (!%p1438_p2)
}
   0xa   :  { %s1442_s29 = scalar_lea.vmem %s31_s19, 8192  ;;  %p1447_p4 = scmp.lt.s32.totalorder %s31_s19, %s31_s19 }
   0xb   :  { %p1443_p3 = scmp.ne.s32.totalorder %s31_s19, %s1442_s29  ;;  %p1448_p5 = scmp.lt.s32.totalorder %s1442_s29, %s1442_s29 }
   0xd   :  { %p1449_p6 = por %p1448_p5, %p1447_p4 }
   0xf   :  { %p1450_p7 = pnand %p1449_p6, %p1443_p3 }
  0x11   :  { %1453 = shalt.err (!%p1450_p7)
}
  0x12   :  { %s1528_s30 = smov 256   ;;  %s1529_s6 = smov 16  }
  0x13   :  { %36 = dma.hbm_to_vmem [thread:$0]  %s1663_s1, 8192, %s31_s19, [#allocation7], %s1528_s30, %s1528_s30, %s1529_s6  }
  0x14   :  { %s1454_s11 = scalar_lea.hbm %s1662_s0, 512 }
  0x15   :  { %p1455_p8 = scmp.ne.s32.totalorder %s1662_s0, %s1454_s11  ;;  %p1458_p9 = scmp.lt.u32.totalorder %s1454_s11, %s1662_s0 }
  0x17   :  { %p1460_p10 = pnand %p1458_p9, %p1455_p8 }
  0x19   :  { %1463 = shalt.err (!%p1460_p10)
}
  0x1a   :  { %s1464_s16 = scalar_lea.vmem %s1564_s21, 512  ;;  %p1469_p12 = scmp.lt.s32.totalorder %s1564_s21, %s1564_s21 }
  0x1b   :  { %p1465_p11 = scmp.ne.s32.totalorder %s1564_s21, %s1464_s16  ;;  %p1470_p13 = scmp.lt.s32.totalorder %s1464_s16, %s1464_s16 }
  0x1d   :  { %p1471_p0 = por %p1470_p13, %p1469_p12 }
  0x1f   :  { %p1472_p1 = pnand %p1471_p0, %p1465_p11 }
  0x21   :  { %1475 = shalt.err (!%p1472_p1)
}
  0x22   :  { %24 = dma.hbm_to_vmem [thread:$0]  %s1662_s0, 512, %s1564_s21, [#allocation4], %s1528_s30, %s1528_s30, %s1529_s6  }
  0x23   :  { %s1530_s18 = smov [#allocation8]   ;;  %s1476_s23 = scalar_lea.hbm %s1665_s3, 8192 }
  0x24   :  { %s44_s19 = sshll.u32 %s1530_s18, 4  ;;  %p1477_p2 = scmp.ne.s32.totalorder %s1665_s3, %s1476_s23  ;;  %s45_s19 = int_to_ptr.vmem [resolvable:$true] %s44_s19 }
  0x25   :  { %p1480_p3 = scmp.lt.u32.totalorder %s1476_s23, %s1665_s3 }
  0x27   :  { %p1482_p4 = pnand %p1480_p3, %p1477_p2 }
  0x29   :  { %1485 = shalt.err (!%p1482_p4)
}
  0x2a   :  { %s1486_s28 = scalar_lea.vmem %s45_s19, 8192  ;;  %p1491_p6 = scmp.lt.s32.totalorder %s45_s19, %s45_s19 }
  0x2b   :  { %p1487_p5 = scmp.ne.s32.totalorder %s45_s19, %s1486_s28  ;;  %p1492_p7 = scmp.lt.s32.totalorder %s1486_s28, %s1486_s28 }
  0x2d   :  { %p1493_p8 = por %p1492_p7, %p1491_p6 }
  0x2f   :  { %p1494_p9 = pnand %p1493_p8, %p1487_p5 }
  0x31   :  { %1497 = shalt.err (!%p1494_p9)
}
  0x32   :  { %s1531_s0 = smov 128   ;;  %s1532_s21 = smov 8  }
  0x33   :  { %50 = dma.hbm_to_vmem [thread:$0]  %s1665_s3, 8192, %s45_s19, [#allocation7], %s1531_s0, %s1531_s0, %s1532_s21  }
  0x34   :  { %1520 = dma.done.wait [#allocation4], 512  }
  0x35   :  { %1521 = vsyncadd [#allocation4], 4294966784 }
  0x36   :  { %1522 = dma.done.wait [#allocation7], 16384  }
  0x37   :  { %1523 = vsyncadd [#allocation7], 4294950912  ;;  %v1240_v0 = vld [vmem:[#allocation6 + $0x4] ss:$16 sps:$4 sm:$0xff]   ;;  %v1242_v1 = vld [vmem:[#allocation6] ss:$16 sps:$4 sm:$0xff]  }
  0x38   :  { %478 = vmatprep.subr.bf16.mxu1 %v1240_v0  ;;  %v1243_v2 = vld [vmem:[#allocation6 + $0x24] ss:$16 sps:$4 sm:$0xff]   ;;  %v1245_v3 = vld [vmem:[#allocation6 + $0x20] ss:$16 sps:$4 sm:$0xff]   ;;  %v67_v13 = vld [vmem:[#allocation3 + $0x8] sm:$0xff]  ;;  %s1533_s10 = smov [#allocation9]  }
  0x39   :  { %479 = vmatpush1.bf16.msra.mxu1 %v1242_v1  ;;  %v1246_v4 = vld [vmem:[#allocation6 + $0x44] ss:$16 sps:$4 sm:$0xff]   ;;  %v1248_v5 = vld [vmem:[#allocation6 + $0x40] ss:$16 sps:$4 sm:$0xff]   ;;  %v69_v14 = vld [vmem:[#allocation3 + $0x18] sm:$0xff]  ;;  %s1083_s11 = sshll.u32 %s1533_s10, 4  ;;  %s1084_s11 = int_to_ptr.vmem [resolvable:$true] %s1083_s11 }
  0x3a   :  { %480 = vmatprep.subr.bf16.mxu1 %v1243_v2  ;;  %v1249_v6 = vld [vmem:[#allocation6 + $0x64] ss:$16 sps:$4 sm:$0xff]   ;;  %v1251_v7 = vld [vmem:[#allocation6 + $0x60] ss:$16 sps:$4 sm:$0xff]   ;;  %v1613_v15 = vpack.c.bf16 %v69_v14, %v67_v13  ;;  %v1290_v46 = vld [vmem:[#allocation6 + $0xc] ss:$16 sps:$4 sm:$0xff]   ;;  %p1503_p11 = scmp.lt.s32.totalorder %s1084_s11, %s1084_s11 }
  0x3b   :  { %v1252_v8 = vld [vmem:[#allocation6 + $0x84] ss:$16 sps:$4 sm:$0xff]   ;;  %v1254_v9 = vld [vmem:[#allocation6 + $0x80] ss:$16 sps:$4 sm:$0xff]   ;;  %v1288_v49 = vld [vmem:[#allocation6 + $0x8] ss:$16 sps:$4 sm:$0xff]  }
  0x3c   :  { %v1255_v10 = vld [vmem:[#allocation6 + $0xa4] ss:$16 sps:$4 sm:$0xff]   ;;  %v1257_v11 = vld [vmem:[#allocation6 + $0xa0] ss:$16 sps:$4 sm:$0xff]   ;;  %510 = vmatprep.mubr.bf16.mxu1 %v1613_v15  ;;  %v1293_v51 = vld [vmem:[#allocation6 + $0x2c] ss:$16 sps:$4 sm:$0xff]  }
  0x3d   :  { %481 = vmatpush1.bf16.msra.mxu1 %v1245_v3  ;;  %v1258_v12 = vld [vmem:[#allocation6 + $0xc4] ss:$16 sps:$4 sm:$0xff]   ;;  %v1260_v16 = vld [vmem:[#allocation6 + $0xc0] ss:$16 sps:$4 sm:$0xff]   ;;  %v1291_v54 = vld [vmem:[#allocation6 + $0x28] ss:$16 sps:$4 sm:$0xff]  }
  0x3e   :  { %482 = vmatprep.subr.bf16.mxu1 %v1246_v4  ;;  %v1261_v17 = vld [vmem:[#allocation6 + $0xe4] ss:$16 sps:$4 sm:$0xff]   ;;  %v1263_v18 = vld [vmem:[#allocation6 + $0xe0] ss:$16 sps:$4 sm:$0xff]   ;;  %v1296_v55 = vld [vmem:[#allocation6 + $0x4c] ss:$16 sps:$4 sm:$0xff]  }
  0x3f   :  { %v1264_v19 = vld [vmem:[#allocation6 + $0x104] ss:$16 sps:$4 sm:$0xff]   ;;  %v1266_v20 = vld [vmem:[#allocation6 + $0x100] ss:$16 sps:$4 sm:$0xff]   ;;  %v1294_v58 = vld [vmem:[#allocation6 + $0x48] ss:$16 sps:$4 sm:$0xff]  }
  0x40   :  { %v1267_v21 = vld [vmem:[#allocation6 + $0x124] ss:$16 sps:$4 sm:$0xff]   ;;  %v1269_v22 = vld [vmem:[#allocation6 + $0x120] ss:$16 sps:$4 sm:$0xff]   ;;  %v1299_v59 = vld [vmem:[#allocation6 + $0x6c] ss:$16 sps:$4 sm:$0xff]  }
  0x41   :  { %483 = vmatpush1.bf16.msra.mxu1 %v1248_v5  ;;  %v1270_v23 = vld [vmem:[#allocation6 + $0x144] ss:$16 sps:$4 sm:$0xff]   ;;  %v1272_v24 = vld [vmem:[#allocation6 + $0x140] ss:$16 sps:$4 sm:$0xff]   ;;  %v1297_v62 = vld [vmem:[#allocation6 + $0x68] ss:$16 sps:$4 sm:$0xff]  }
  0x42   :  { %484 = vmatprep.subr.bf16.mxu1 %v1249_v6  ;;  %v1273_v25 = vld [vmem:[#allocation6 + $0x164] ss:$16 sps:$4 sm:$0xff]   ;;  %v1275_v26 = vld [vmem:[#allocation6 + $0x160] ss:$16 sps:$4 sm:$0xff]   ;;  %v1302_v63 = vld [vmem:[#allocation6 + $0x8c] ss:$16 sps:$4 sm:$0xff]  }
  0x43   :  { %v1276_v27 = vld [vmem:[#allocation6 + $0x184] ss:$16 sps:$4 sm:$0xff]   ;;  %v1338_v29 = vld [vmem:[#allocation8] ss:$8 sps:$4 sm:$0xff]   ;;  %v1341_v33 = vld [vmem:[#allocation8 + $0x10] ss:$8 sps:$4 sm:$0xff]  }
  0x44   :  { %v1336_v28 = vld [vmem:[#allocation8 + $0x4] ss:$8 sps:$4 sm:$0xff]   ;;  %v1278_v30 = vld [vmem:[#allocation6 + $0x180] ss:$16 sps:$4 sm:$0xff]   ;;  %v1339_v31 = vld [vmem:[#allocation8 + $0x14] ss:$8 sps:$4 sm:$0xff]  }
  0x45   :  { %485 = vmatpush1.bf16.msra.mxu1 %v1251_v7  ;;  %988 = vmatprep.subr.bf16.mxu0 %v1336_v28  ;;  %v1279_v32 = vld [vmem:[#allocation6 + $0x1a4] ss:$16 sps:$4 sm:$0xff]   ;;  %v1281_v35 = vld [vmem:[#allocation6 + $0x1a0] ss:$16 sps:$4 sm:$0xff]   ;;  %v1300_v2 = vld [vmem:[#allocation6 + $0x88] ss:$16 sps:$4 sm:$0xff]  }
  0x46   :  { %486 = vmatprep.subr.bf16.mxu1 %v1252_v8  ;;  %989 = vmatpush1.bf16.msra.mxu0 %v1338_v29  ;;  %v1342_v34 = vld [vmem:[#allocation8 + $0x24] ss:$8 sps:$4 sm:$0xff]   ;;  %v1344_v37 = vld [vmem:[#allocation8 + $0x20] ss:$8 sps:$4 sm:$0xff]   ;;  %v1345_v38 = vld [vmem:[#allocation8 + $0x34] ss:$8 sps:$4 sm:$0xff]  }
  0x47   :  { %990 = vmatprep.subr.bf16.mxu0 %v1339_v31  ;;  %v1282_v36 = vld [vmem:[#allocation6 + $0x1c4] ss:$16 sps:$4 sm:$0xff]   ;;  %v1284_v39 = vld [vmem:[#allocation6 + $0x1c0] ss:$16 sps:$4 sm:$0xff]   ;;  %v1305_v3 = vld [vmem:[#allocation6 + $0xac] ss:$16 sps:$4 sm:$0xff]  }
  0x48   :  { %v1285_v40 = vld [vmem:[#allocation6 + $0x1e4] ss:$16 sps:$4 sm:$0xff]   ;;  %v1347_v41 = vld [vmem:[#allocation8 + $0x30] ss:$8 sps:$4 sm:$0xff]   ;;  %v1350_v47 = vld [vmem:[#allocation8 + $0x40] ss:$8 sps:$4 sm:$0xff]  }
  0x49   :  { %487 = vmatpush1.bf16.msra.mxu1 %v1254_v9  ;;  %v1348_v42 = vld [vmem:[#allocation8 + $0x44] ss:$8 sps:$4 sm:$0xff]   ;;  %v1287_v43 = vld [vmem:[#allocation6 + $0x1e0] ss:$16 sps:$4 sm:$0xff]   ;;  %v1351_v48 = vld [vmem:[#allocation8 + $0x54] ss:$8 sps:$4 sm:$0xff]  }
  0x4a   :  { %488 = vmatprep.subr.bf16.mxu1 %v1255_v10  ;;  %991 = vmatpush1.bf16.msra.mxu0 %v1341_v33  ;;  %v66_v44 = vld [vmem:[#allocation3] sm:$0xff]  ;;  %v68_v45 = vld [vmem:[#allocation3 + $0x10] sm:$0xff]  ;;  %v1303_v6 = vld [vmem:[#allocation6 + $0xa8] ss:$16 sps:$4 sm:$0xff]  }
  0x4b   :  { %992 = vmatprep.subr.bf16.mxu0 %v1342_v34  ;;  %v1616_v50 = vpack.c.bf16 %v68_v45, %v66_v44  ;;  %v1353_v52 = vld [vmem:[#allocation8 + $0x50] ss:$8 sps:$4 sm:$0xff]   ;;  %v1354_v53 = vld [vmem:[#allocation8 + $0x64] ss:$8 sps:$4 sm:$0xff]   ;;  %v1356_v56 = vld [vmem:[#allocation8 + $0x60] ss:$8 sps:$4 sm:$0xff]  }
  0x4c   :  { %v1357_v57 = vld [vmem:[#allocation8 + $0x74] ss:$8 sps:$4 sm:$0xff]   ;;  %v1359_v60 = vld [vmem:[#allocation8 + $0x70] ss:$8 sps:$4 sm:$0xff]   ;;  %v1360_v61 = vld [vmem:[#allocation8 + $0x84] ss:$8 sps:$4 sm:$0xff]  }
  0x4d   :  { %489 = vmatpush1.bf16.msra.mxu1 %v1257_v11  ;;  %v1362_v0 = vld [vmem:[#allocation8 + $0x80] ss:$8 sps:$4 sm:$0xff]   ;;  %v1363_v1 = vld [vmem:[#allocation8 + $0x94] ss:$8 sps:$4 sm:$0xff]   ;;  %v1365_v4 = vld [vmem:[#allocation8 + $0x90] ss:$8 sps:$4 sm:$0xff]  }
  0x4e   :  { %490 = vmatprep.subr.bf16.mxu1 %v1258_v12  ;;  %993 = vmatpush1.bf16.msra.mxu0 %v1344_v37  ;;  %v1366_v5 = vld [vmem:[#allocation8 + $0xa4] ss:$8 sps:$4 sm:$0xff]   ;;  %v1368_v8 = vld [vmem:[#allocation8 + $0xa0] ss:$8 sps:$4 sm:$0xff]   ;;  %v1369_v9 = vld [vmem:[#allocation8 + $0xb4] ss:$8 sps:$4 sm:$0xff]  }
  0x4f   :  { %994 = vmatprep.subr.bf16.mxu0 %v1345_v38  ;;  %v1308_v7 = vld [vmem:[#allocation6 + $0xcc] ss:$16 sps:$4 sm:$0xff]   ;;  %v1306_v10 = vld [vmem:[#allocation6 + $0xc8] ss:$16 sps:$4 sm:$0xff]  }
  0x50   :  { %v1311_v11 = vld [vmem:[#allocation6 + $0xec] ss:$16 sps:$4 sm:$0xff]   ;;  %v1371_v12 = vld [vmem:[#allocation8 + $0xb0] ss:$8 sps:$4 sm:$0xff]  }
  0x51   :  { %491 = vmatpush1.bf16.msra.mxu1 %v1260_v16  ;;  %v1372_v13 = vld [vmem:[#allocation8 + $0xc4] ss:$8 sps:$4 sm:$0xff]   ;;  %v1309_v14 = vld [vmem:[#allocation6 + $0xe8] ss:$16 sps:$4 sm:$0xff]  }
  0x52   :  { %492 = vmatprep.subr.bf16.mxu1 %v1261_v17  ;;  %995 = vmatpush1.bf16.msra.mxu0 %v1347_v41  ;;  %v1374_v16 = vld [vmem:[#allocation8 + $0xc0] ss:$8 sps:$4 sm:$0xff]   ;;  %v1375_v17 = vld [vmem:[#allocation8 + $0xd4] ss:$8 sps:$4 sm:$0xff]   ;;  %v1377_v33 = vld [vmem:[#allocation8 + $0xd0] ss:$8 sps:$4 sm:$0xff]  }
  0x53   :  { %996 = vmatprep.subr.bf16.mxu0 %v1348_v42  ;;  %v1327_v28 = vld [vmem:[#allocation6 + $0x1a8] ss:$16 sps:$4 sm:$0xff]   ;;  %v1332_v29 = vld [vmem:[#allocation6 + $0x1cc] ss:$16 sps:$4 sm:$0xff]   ;;  %v1627_v42 = vld [vmem:[%s1664_s2] sm:$0xf] }
  0x54   :  { %v1335_v31 = vld [vmem:[#allocation6 + $0x1ec] ss:$16 sps:$4 sm:$0xff]   ;;  %v1383_v37 = vld [vmem:[#allocation8 + $0xf0] ss:$8 sps:$4 sm:$0xff]  }
  0x55   :  { %493 = vmatpush1.bf16.msra.mxu1 %v1263_v18  ;;  %v1312_v18 = vld [vmem:[#allocation6 + $0x108] ss:$16 sps:$4 sm:$0xff]   ;;  %v1378_v34 = vld [vmem:[#allocation8 + $0xe4] ss:$8 sps:$4 sm:$0xff]  }
  0x56   :  { %494 = vmatprep.subr.bf16.mxu1 %v1264_v19  ;;  %997 = vmatpush1.bf16.msra.mxu0 %v1350_v47  ;;  %v1317_v19 = vld [vmem:[#allocation6 + $0x12c] ss:$16 sps:$4 sm:$0xff]  }
  0x57   :  { %998 = vmatprep.subr.bf16.mxu0 %v1351_v48  ;;  %v1386_v38 = vld [vmem:[#allocation8 + $0x104] ss:$8 sps:$4 sm:$0xff]  }
  0x59   :  { %495 = vmatpush1.bf16.msra.mxu1 %v1266_v20  ;;  %v1315_v20 = vld [vmem:[#allocation6 + $0x128] ss:$16 sps:$4 sm:$0xff]  }
  0x5a   :  { %496 = vmatprep.subr.bf16.mxu1 %v1267_v21  ;;  %999 = vmatpush1.bf16.msra.mxu0 %v1353_v52  ;;  %v1320_v21 = vld [vmem:[#allocation6 + $0x14c] ss:$16 sps:$4 sm:$0xff]  }
  0x5b   :  { %1000 = vmatprep.subr.bf16.mxu0 %v1354_v53 }
  0x5d   :  { %497 = vmatpush1.bf16.msra.mxu1 %v1269_v22  ;;  %v1318_v22 = vld [vmem:[#allocation6 + $0x148] ss:$16 sps:$4 sm:$0xff]  }
  0x5e   :  { %498 = vmatprep.subr.bf16.mxu1 %v1270_v23  ;;  %1001 = vmatpush1.bf16.msra.mxu0 %v1356_v56  ;;  %v1323_v23 = vld [vmem:[#allocation6 + $0x16c] ss:$16 sps:$4 sm:$0xff]  }
  0x5f   :  { %1002 = vmatprep.subr.bf16.mxu0 %v1357_v57 }
  0x61   :  { %499 = vmatpush1.bf16.msra.mxu1 %v1272_v24  ;;  %v1321_v24 = vld [vmem:[#allocation6 + $0x168] ss:$16 sps:$4 sm:$0xff]  }
  0x62   :  { %500 = vmatprep.subr.bf16.mxu1 %v1273_v25  ;;  %1003 = vmatpush1.bf16.msra.mxu0 %v1359_v60  ;;  %v1326_v25 = vld [vmem:[#allocation6 + $0x18c] ss:$16 sps:$4 sm:$0xff]   ;;  %v1384_v60 = vld [vmem:[#allocation8 + $0x100] ss:$8 sps:$4 sm:$0xff]  }
  0x63   :  { %1004 = vmatprep.subr.bf16.mxu0 %v1360_v61  ;;  %v1389_v61 = vld [vmem:[#allocation8 + $0x114] ss:$8 sps:$4 sm:$0xff]  }
  0x65   :  { %501 = vmatpush1.bf16.msra.mxu1 %v1275_v26  ;;  %v1324_v26 = vld [vmem:[#allocation6 + $0x188] ss:$16 sps:$4 sm:$0xff]  }
  0x66   :  { %502 = vmatprep.subr.bf16.mxu1 %v1276_v27  ;;  %1005 = vmatpush1.bf16.msra.mxu0 %v1362_v0  ;;  %v1329_v27 = vld [vmem:[#allocation6 + $0x1ac] ss:$16 sps:$4 sm:$0xff]   ;;  %v1390_v0 = vld [vmem:[#allocation8 + $0x120] ss:$8 sps:$4 sm:$0xff]  }
  0x67   :  { %1006 = vmatprep.subr.bf16.mxu0 %v1363_v1  ;;  %v1395_v1 = vld [vmem:[#allocation8 + $0x134] ss:$8 sps:$4 sm:$0xff]  }
  0x69   :  { %503 = vmatpush1.bf16.msra.mxu1 %v1278_v30  ;;  %v1330_v30 = vld [vmem:[#allocation6 + $0x1c8] ss:$16 sps:$4 sm:$0xff]  }
  0x6a   :  { %504 = vmatprep.subr.bf16.mxu1 %v1279_v32  ;;  %1007 = vmatpush1.bf16.msra.mxu0 %v1365_v4  ;;  %v1333_v32 = vld [vmem:[#allocation6 + $0x1e8] ss:$16 sps:$4 sm:$0xff]  }
  0x6b   :  { %1008 = vmatprep.subr.bf16.mxu0 %v1366_v5  ;;  %v1396_v4 = vld [vmem:[#allocation8 + $0x140] ss:$8 sps:$4 sm:$0xff]   ;;  %v1401_v5 = vld [vmem:[#allocation8 + $0x154] ss:$8 sps:$4 sm:$0xff]  }
  0x6d   :  { %505 = vmatpush1.bf16.msra.mxu1 %v1281_v35  ;;  %v1380_v35 = vld [vmem:[#allocation8 + $0xe0] ss:$8 sps:$4 sm:$0xff]  }
  0x6e   :  { %506 = vmatprep.subr.bf16.mxu1 %v1282_v36  ;;  %1009 = vmatpush1.bf16.msra.mxu0 %v1368_v8  ;;  %v1381_v36 = vld [vmem:[#allocation8 + $0xf4] ss:$8 sps:$4 sm:$0xff]   ;;  %v1402_v8 = vld [vmem:[#allocation8 + $0x160] ss:$8 sps:$4 sm:$0xff]  }
  0x6f   :  { %1010 = vmatprep.subr.bf16.mxu0 %v1369_v9  ;;  %v1407_v9 = vld [vmem:[#allocation8 + $0x174] ss:$8 sps:$4 sm:$0xff]  }
  0x71   :  { %507 = vmatpush1.bf16.msra.mxu1 %v1284_v39  ;;  %v138_v39 = vlaneseq }
  0x72   :  { %508 = vmatprep.subr.bf16.mxu1 %v1285_v40  ;;  %1011 = vmatpush1.bf16.msra.mxu0 %v1371_v12  ;;  %v1408_v12 = vld [vmem:[#allocation8 + $0x180] ss:$8 sps:$4 sm:$0xff]  }
  0x73   :  { %1012 = vmatprep.subr.bf16.mxu0 %v1372_v13  ;;  %v1621_v40 = vshrl.u32 %v138_v39, 7  ;;  %v1413_v13 = vld [vmem:[#allocation8 + $0x194] ss:$8 sps:$4 sm:$0xff]  }
  0x75   :  { %509 = vmatpush1.bf16.msra.mxu1 %v1287_v43  ;;  %v140_v41 = vsub.s32 0, %v1621_v40  ;;  %v144_v43 = vsub.s32 1, %v1621_v40 }
  0x76   :  { %521 = vmatprep.subr.bf16.mxu1 %v1290_v46  ;;  %1013 = vmatpush1.bf16.msra.mxu0 %v1374_v16  ;;  %v1414_v16 = vld [vmem:[#allocation8 + $0x1a0] ss:$8 sps:$4 sm:$0xff]  }
  0x77   :  { %1014 = vmatprep.subr.bf16.mxu0 %v1375_v17  ;;  %v141_v44 = vrot.slane %v1627_v42, %v140_v41  ;;  %v145_v45 = vrot.slane %v1627_v42, %v144_v43  ;;  %v1419_v17 = vld [vmem:[#allocation8 + $0x1b4] ss:$8 sps:$4 sm:$0xff]  }
  0x78   :  { %511 = vmatmul.mubr.bf16.vlgmr.msra.gmra.mrb[0].mxu1 %v1616_v50 }
  0x79   :  { %522 = vmatpush1.bf16.msra.mxu1 %v1288_v49  ;;  %553 = vmatprep.mubr.bf16.mxu1 %v1613_v15  ;;  %v1314_v15 = vld [vmem:[#allocation6 + $0x10c] ss:$16 sps:$4 sm:$0xff]  }
  0x7a   :  { %523 = vmatprep.subr.bf16.mxu1 %v1293_v51  ;;  %1015 = vmatpush1.bf16.msra.mxu0 %v1377_v33 }
  0x7b   :  { %1016 = vmatprep.subr.bf16.mxu0 %v1378_v34 }
  0x7d   :  { %524 = vmatpush1.bf16.msra.mxu1 %v1291_v54 }
  0x7e   :  { %525 = vmatprep.subr.bf16.mxu1 %v1296_v55  ;;  %1017 = vmatpush1.bf16.msra.mxu0 %v1380_v35 }
  0x7f   :  { %1018 = vmatprep.subr.bf16.mxu0 %v1381_v36 }
  0x81   :  { %526 = vmatpush1.bf16.msra.mxu1 %v1294_v58 }
  0x82   :  { %527 = vmatprep.subr.bf16.mxu1 %v1299_v59  ;;  %1019 = vmatpush1.bf16.msra.mxu0 %v1383_v37 }
  0x83   :  { %1031 = vmatprep.subr.bf16.mxu0 %v1386_v38  ;;  %v1429_v38 = vld [vmem:[#allocation8 + $0x1f0] ss:$8 sps:$4 sm:$0xff]  }
  0x85   :  { %528 = vmatpush1.bf16.msra.mxu1 %v1297_v62  ;;  %v1387_v62 = vld [vmem:[#allocation8 + $0x110] ss:$8 sps:$4 sm:$0xff]  }
  0x86   :  { %529 = vmatprep.subr.bf16.mxu1 %v1302_v63  ;;  %v1392_v63 = vld [vmem:[#allocation8 + $0x124] ss:$8 sps:$4 sm:$0xff]  }
  0x89   :  { %530 = vmatpush1.bf16.msra.mxu1 %v1300_v2  ;;  %v1393_v2 = vld [vmem:[#allocation8 + $0x130] ss:$8 sps:$4 sm:$0xff]  }
  0x8a   :  { %531 = vmatprep.subr.bf16.mxu1 %v1305_v3  ;;  %v1398_v3 = vld [vmem:[#allocation8 + $0x144] ss:$8 sps:$4 sm:$0xff]  }
  0x8d   :  { %532 = vmatpush1.bf16.msra.mxu1 %v1303_v6  ;;  %v1399_v6 = vld [vmem:[#allocation8 + $0x150] ss:$8 sps:$4 sm:$0xff]  }
  0x8e   :  { %533 = vmatprep.subr.bf16.mxu1 %v1308_v7  ;;  %v1404_v7 = vld [vmem:[#allocation8 + $0x164] ss:$8 sps:$4 sm:$0xff]  }
  0x91   :  { %534 = vmatpush1.bf16.msra.mxu1 %v1306_v10  ;;  %v1405_v10 = vld [vmem:[#allocation8 + $0x170] ss:$8 sps:$4 sm:$0xff]  }
  0x92   :  { %535 = vmatprep.subr.bf16.mxu1 %v1311_v11  ;;  %v1410_v11 = vld [vmem:[#allocation8 + $0x184] ss:$8 sps:$4 sm:$0xff]  }
  0x95   :  { %536 = vmatpush1.bf16.msra.mxu1 %v1309_v14  ;;  %v1411_v14 = vld [vmem:[#allocation8 + $0x190] ss:$8 sps:$4 sm:$0xff]  }
  0x96   :  { %537 = vmatprep.subr.bf16.mxu1 %v1314_v15  ;;  %v1416_v15 = vld [vmem:[#allocation8 + $0x1a4] ss:$8 sps:$4 sm:$0xff]  }
  0x99   :  { %538 = vmatpush1.bf16.msra.mxu1 %v1312_v18  ;;  %v1417_v18 = vld [vmem:[#allocation8 + $0x1b0] ss:$8 sps:$4 sm:$0xff]  }
  0x9a   :  { %539 = vmatprep.subr.bf16.mxu1 %v1317_v19  ;;  %v1422_v19 = vld [vmem:[#allocation8 + $0x1c4] ss:$8 sps:$4 sm:$0xff]  }
  0x9d   :  { %540 = vmatpush1.bf16.msra.mxu1 %v1315_v20  ;;  %v1420_v20 = vld [vmem:[#allocation8 + $0x1c0] ss:$8 sps:$4 sm:$0xff]  }
  0x9e   :  { %541 = vmatprep.subr.bf16.mxu1 %v1320_v21  ;;  %v1425_v21 = vld [vmem:[#allocation8 + $0x1d4] ss:$8 sps:$4 sm:$0xff]  }
  0xa1   :  { %542 = vmatpush1.bf16.msra.mxu1 %v1318_v22  ;;  %v148_v22 = vsub.s32 2, %v1621_v40 }
  0xa2   :  { %543 = vmatprep.subr.bf16.mxu1 %v1323_v23  ;;  %v152_v23 = vsub.s32 3, %v1621_v40 }
  0xa5   :  { %544 = vmatpush1.bf16.msra.mxu1 %v1321_v24  ;;  %v1423_v24 = vld [vmem:[#allocation8 + $0x1d0] ss:$8 sps:$4 sm:$0xff]  }
  0xa6   :  { %545 = vmatprep.subr.bf16.mxu1 %v1326_v25  ;;  %v149_v25 = vrot.slane %v1627_v42, %v148_v22 }
  0xa9   :  { %546 = vmatpush1.bf16.msra.mxu1 %v1324_v26  ;;  %v1428_v26 = vld [vmem:[#allocation8 + $0x1e4] ss:$8 sps:$4 sm:$0xff]  }
  0xaa   :  { %547 = vmatprep.subr.bf16.mxu1 %v1329_v27  ;;  %v153_v27 = vrot.slane %v1627_v42, %v152_v23 }
  0xad   :  { %548 = vmatpush1.bf16.msra.mxu1 %v1327_v28 }
  0xae   :  { %549 = vmatprep.subr.bf16.mxu1 %v1332_v29  ;;  %v1426_v29 = vld [vmem:[#allocation8 + $0x1e0] ss:$8 sps:$4 sm:$0xff]  }
  0xb1   :  { %550 = vmatpush1.bf16.msra.mxu1 %v1330_v30 }
  0xb2   :  { %551 = vmatprep.subr.bf16.mxu1 %v1335_v31 }
  0xb5   :  { %552 = vmatpush1.bf16.msra.mxu1 %v1333_v32  ;;  %v1431_v32 = vld [vmem:[#allocation8 + $0x1f4] ss:$8 sps:$4 sm:$0xff]  }
  0xb8   :  { %554 = vmatmul.mubr.bf16.vlgmr.msra.gmra.mrb[4].mxu1 %v1616_v50 }
 0x14b   :  { %v512_v46 = vpop.f32.mrb[0].mxu1 }
 0x14c   :  { %v513_v47 = vadd.f32 %v512_v46, %v141_v44  ;;  %v514_v48 = vpop.f32.mrb[1].mxu1 }
 0x14d   :  { %v515_v49 = vadd.f32 %v514_v48, %v145_v45  ;;  %v516_v50 = vpop.f32.mrb[2].mxu1  ;;  %v656_v48 = vld [vmem:[%s1666_s4] sm:$0x3]  ;;  %s1498_s4 = scalar_lea.vmem %s1084_s11, 512 }
 0x14e   :  { %v564_v51 = vmax.f32 %v513_v47, 0.0  ;;  %v517_v52 = vadd.f32 %v516_v50, %v141_v44  ;;  %v518_v53 = vpop.f32.mrb[3].mxu1  ;;  %v665_v50 = vrot.slane %v656_v48, %v144_v43  ;;  %p1499_p10 = scmp.ne.s32.totalorder %s1084_s11, %s1498_s4  ;;  %p1504_p12 = scmp.lt.s32.totalorder %s1498_s4, %s1498_s4 }
 0x14f   :  { %v519_v54 = vadd.f32 %v518_v53, %v145_v45  ;;  %v565_v56 = vmax.f32 %v515_v49, 0.0  ;;  %v661_v49 = vrot.slane %v656_v48, %v140_v41 }
 0x150   :  { %v568_v55 = vmax.f32 %v517_v52, 0.0  ;;  %p1505_p13 = por %p1504_p12, %p1503_p11 }
 0x151   :  { %v569_v57 = vmax.f32 %v519_v54, 0.0 }
 0x152   :  { %v588_v58 = vpack.c.bf16 %v568_v55, %v564_v51  ;;  %p1506_p0 = pnand %p1505_p13, %p1499_p10 }
 0x153   :  { %v589_v59 = vpack.c.bf16 %v569_v57, %v565_v56 }
 0x155   :  { %1020 = vmatprep.mubr.bf16.mxu0 %v589_v59 }
 0x156   :  { %1021 = vmatmul.mubr.bf16.vlgmr.msra.gmra.mrb[0].mxu0 %v588_v58 }
 0x157   :  { %1032 = vmatpush1.bf16.msra.mxu0 %v1384_v60 }
 0x158   :  { %1033 = vmatprep.subr.bf16.mxu0 %v1389_v61 }
 0x15b   :  { %1034 = vmatpush1.bf16.msra.mxu0 %v1387_v62 }
 0x15c   :  { %1035 = vmatprep.subr.bf16.mxu0 %v1392_v63 }
 0x15f   :  { %1036 = vmatpush1.bf16.msra.mxu0 %v1390_v0 }
 0x160   :  { %1037 = vmatprep.subr.bf16.mxu0 %v1395_v1 }
 0x163   :  { %1038 = vmatpush1.bf16.msra.mxu0 %v1393_v2 }
 0x164   :  { %1039 = vmatprep.subr.bf16.mxu0 %v1398_v3 }
 0x167   :  { %1040 = vmatpush1.bf16.msra.mxu0 %v1396_v4 }
 0x168   :  { %1041 = vmatprep.subr.bf16.mxu0 %v1401_v5 }
 0x16b   :  { %1042 = vmatpush1.bf16.msra.mxu0 %v1399_v6 }
 0x16c   :  { %1043 = vmatprep.subr.bf16.mxu0 %v1404_v7 }
 0x16f   :  { %1044 = vmatpush1.bf16.msra.mxu0 %v1402_v8 }
 0x170   :  { %1045 = vmatprep.subr.bf16.mxu0 %v1407_v9 }
 0x173   :  { %1046 = vmatpush1.bf16.msra.mxu0 %v1405_v10 }
 0x174   :  { %1047 = vmatprep.subr.bf16.mxu0 %v1410_v11 }
 0x177   :  { %1048 = vmatpush1.bf16.msra.mxu0 %v1408_v12 }
 0x178   :  { %1049 = vmatprep.subr.bf16.mxu0 %v1413_v13 }
 0x17b   :  { %1050 = vmatpush1.bf16.msra.mxu0 %v1411_v14 }
 0x17c   :  { %1051 = vmatprep.subr.bf16.mxu0 %v1416_v15 }
 0x17f   :  { %1052 = vmatpush1.bf16.msra.mxu0 %v1414_v16 }
 0x180   :  { %1053 = vmatprep.subr.bf16.mxu0 %v1419_v17 }
 0x183   :  { %1054 = vmatpush1.bf16.msra.mxu0 %v1417_v18 }
 0x184   :  { %1055 = vmatprep.subr.bf16.mxu0 %v1422_v19 }
 0x187   :  { %1056 = vmatpush1.bf16.msra.mxu0 %v1420_v20 }
 0x188   :  { %1057 = vmatprep.subr.bf16.mxu0 %v1425_v21 }
 0x18b   :  { %v555_v28 = vpop.f32.mrb[4].mxu1  ;;  %1058 = vmatpush1.bf16.msra.mxu0 %v1423_v24 }
 0x18c   :  { %v556_v30 = vadd.f32 %v555_v28, %v149_v25  ;;  %v557_v31 = vpop.f32.mrb[5].mxu1  ;;  %1059 = vmatprep.subr.bf16.mxu0 %v1428_v26 }
 0x18d   :  { %v558_v33 = vadd.f32 %v557_v31, %v153_v27  ;;  %v559_v34 = vpop.f32.mrb[6].mxu1 }
 0x18e   :  { %v560_v35 = vadd.f32 %v559_v34, %v149_v25  ;;  %v561_v36 = vpop.f32.mrb[7].mxu1  ;;  %v566_v39 = vmax.f32 %v556_v30, 0.0 }
 0x18f   :  { %v562_v37 = vadd.f32 %v561_v36, %v153_v27  ;;  %1060 = vmatpush1.bf16.msra.mxu0 %v1426_v29  ;;  %v567_v45 = vmax.f32 %v558_v33, 0.0 }
 0x190   :  { %v570_v44 = vmax.f32 %v560_v35, 0.0  ;;  %1061 = vmatprep.subr.bf16.mxu0 %v1431_v32 }
 0x191   :  { %v571_v46 = vmax.f32 %v562_v37, 0.0 }
 0x192   :  { %v590_v42 = vpack.c.bf16 %v570_v44, %v566_v39 }
 0x193   :  { %v591_v47 = vpack.c.bf16 %v571_v46, %v567_v45  ;;  %1062 = vmatpush1.bf16.msra.mxu0 %v1429_v38 }
 0x195   :  { %1063 = vmatprep.mubr.bf16.mxu0 %v591_v47 }
 0x196   :  { %1064 = vmatmul.mubr.bf16.vlgmr.msra.gmra.mrb[0].mxu0 %v590_v42 }
 0x269   :  { %v1065_v51 = vpop.f32.mrb[0].mxu0 }
 0x26a   :  { %v1224_v52 = vadd.f32 %v1065_v51, %v661_v49  ;;  %v1067_v53 = vpop.f32.mrb[1].mxu0 }
 0x26b   :  { %v1225_v54 = vadd.f32 %v1067_v53, %v665_v50  ;;  %v1069_v55 = vpop.f32.mrb[2].mxu0 }
 0x26c   :  { %1074 = vst [vmem:[#allocation9] sm:$0xff] %v1224_v52  ;;  %v1226_v56 = vadd.f32 %v1069_v55, %v661_v49  ;;  %v1071_v57 = vpop.f32.mrb[3].mxu0 }
 0x26d   :  { %1075 = vst [vmem:[#allocation9 + $0x8] sm:$0xff] %v1225_v54  ;;  %v1227_v58 = vadd.f32 %v1071_v57, %v665_v50 }
 0x26e   :  { %1076 = vst [vmem:[#allocation9 + $0x10] sm:$0xff] %v1226_v56 }
 0x26f   :  { %1077 = vst [vmem:[#allocation9 + $0x18] sm:$0xff] %v1227_v58 }
 0x270   :  { %1509 = shalt.err (!%p1506_p0)
}
 0x271   :  { %s1510_s14 = scalar_lea.hbm %s1667_s5, 512 }
 0x272   :  { %p1511_p1 = scmp.ne.s32.totalorder %s1667_s5, %s1510_s14  ;;  %p1514_p2 = scmp.lt.u32.totalorder %s1510_s14, %s1667_s5 }
 0x274   :  { %p1516_p3 = pnand %p1514_p2, %p1511_p1 }
 0x276   :  { %1519 = shalt.err (!%p1516_p3)
}
 0x277   :  { %1089 = dma.vmem_to_hbm [thread:$0]  %s1084_s11, 512, %s1667_s5, [#allocation5], %s1528_s30, %s1528_s30, %s1529_s6  }
 0x278   :  { %1524 = dma.done.wait [#allocation5], 512  }
 0x279   :  { %1525 = vsyncadd [#allocation5], 4294966784 }
 0x27a   :  { %1093 = vsyncpa [#allocation4], 1 }
 0x27b   :  { %1094 = vsyncpa [#allocation7], 1 }
 0x27c   :  { %1095 = vsyncpa [#allocation5], 1 }

</bundles_post_ra>
